<compile_context>
chip_gen: v6e
topology: v6e:2x2x1
jax: 0.10.0
libtpu: 0.0.40
codegen_flags: <defaults>
</compile_context>

<pallas_src>
import jax
import jax.numpy as jnp
from jax.experimental import pallas as pl
from jax.experimental.pallas import tpu as pltpu


def dqn_mlp_kernel(x_ref, w1_ref, b1_ref, w2_ref, b2_ref, w3_ref, b3_ref, o_ref):
    """Fused 3-layer MLP (Linear+ReLU, Linear+ReLU, Linear) for one batch tile."""
    cdt = w1_ref.dtype                               # MXU compute dtype (bf16 or f32)
    x = x_ref[...].astype(cdt)                       # (TB, d_in)

    # fc1 + ReLU : MXU matmul (K = d_in, masked internally), f32 accumulate.
    h1 = jnp.dot(x, w1_ref[...], preferred_element_type=jnp.float32)
    h1 = jnp.maximum(h1 + b1_ref[...], 0.0)          # (TB, 128) f32

    # fc2 + ReLU
    h2 = jnp.dot(h1.astype(cdt), w2_ref[...], preferred_element_type=jnp.float32)
    h2 = jnp.maximum(h2 + b2_ref[...], 0.0)          # (TB, 128) f32

    # fc3 (N=1): VPU multiply + cross-lane (XLU) reduction instead of wasting a
    # full MXU pass on a single output lane.  w3/b3 stay in f32.
    out = jnp.sum(h2 * w3_ref[...], axis=-1, keepdims=True) + b3_ref[...]
    o_ref[...] = out.astype(o_ref.dtype)             # (TB, 1)


def dqn_forward(x, params, *, compute_dtype=jnp.bfloat16, block_b=512):
    """x: (B, state_dim + 4) float32. Returns (B, 1) float32."""
    w1, b1, w2, b2, w3, b3 = params
    B, d_in = x.shape
    assert w1.shape == (d_in, 128), "w1 must be [in_features, 128]"

    # Batch tiling: tile rows are a multiple of 8 sublanes; padded rows produce
    # values that are sliced away after the call.  Features stay unpadded.
    tb = min(block_b, pl.cdiv(B, 8) * 8)
    b_pad = pl.cdiv(B, tb) * tb
    if b_pad != B:
        x = jnp.pad(x, ((0, b_pad - B), (0, 0)))

    # bf16 weights on the MXU path (f32 accumulate) halve the (already tiny)
    # weight DMA and hit the bf16-native MXU on v6e/v7x.
    w1c = w1.astype(compute_dtype)
    w2c = w2.astype(compute_dtype)

    # Constant index_map -> block never changes across the grid, so weights and
    # biases stay resident in VMEM (no re-DMA per batch tile).
    resident = lambda a: pl.BlockSpec(a.shape, lambda i: (0,) * a.ndim)

    out = pl.pallas_call(
        dqn_mlp_kernel,
        out_shape=jax.ShapeDtypeStruct((b_pad, 1), jnp.float32),
        grid=(b_pad // tb,),
        in_specs=[
            pl.BlockSpec((tb, d_in), lambda i: (i, 0)),   # activations, batch-tiled
            resident(w1c), resident(b1),
            resident(w2c), resident(b2),
            resident(w3), resident(b3),
        ],
        out_specs=pl.BlockSpec((tb, 1), lambda i: (i, 0)),
        compiler_params=pltpu.CompilerParams(
            dimension_semantics=("parallel",)),
    )(x, w1c, b1, w2c, b2, w3, b3)

    return out[:B]


def init_params(key, state_dim):
    """Deterministic init mirroring nn.Linear's U(-1/sqrt(fan_in), 1/sqrt(fan_in)).

    Weights are kept as [in_features, out_features] (transposed vs PyTorch) so
    the kernel can do x @ W.  Biases are 2-D (1, out) for lane alignment.
    """
    d_in = state_dim + 4
    dims = [(d_in, 128), (128, 128), (128, 1)]
    keys = jax.random.split(key, 6)
    params = []
    for i, (fan_in, fan_out) in enumerate(dims):
        bound = 1.0 / jnp.sqrt(jnp.float32(fan_in))
        w = jax.random.uniform(keys[2 * i], (fan_in, fan_out),
                               minval=-bound, maxval=bound, dtype=jnp.float32)
        b = jax.random.uniform(keys[2 * i + 1], (1, fan_out),
                               minval=-bound, maxval=bound, dtype=jnp.float32)
        params += [w, b]
    w1, b1, w2, b2, w3, b3 = params
    # fc3 weight is used as a (1, 128) row inside the kernel (VPU/XLU reduction).
    w3 = w3.reshape(1, 128)
    return (w1, b1, w2, b2, w3, b3)


def dqn_reference(x, params):
    """Plain-JAX f32 reference for correctness checking."""
    w1, b1, w2, b2, w3, b3 = params
    h1 = jnp.maximum(x @ w1 + b1, 0.0)
    h2 = jnp.maximum(h1 @ w2 + b2, 0.0)
    return h2 @ w3.T + b3


if __name__ == "__main__":
    key = jax.random.PRNGKey(0)
    k_param, k_x1, k_x2 = jax.random.split(key, 3)

    state_dim = 32           # checkers board: 8x4 playable squares
    params = init_params(k_param, state_dim)

    # 1) small batch, single tile, exact f32 path -> tight tolerance
    x_small = jax.random.normal(k_x1, (8, state_dim + 4), dtype=jnp.float32)
    out_f32 = jax.block_until_ready(
        dqn_forward(x_small, params, compute_dtype=jnp.float32))
    ref_small = dqn_reference(x_small, params)
    assert out_f32.shape == (8, 1)
    assert jnp.allclose(out_f32, ref_small, atol=1e-4, rtol=1e-4), "f32 mismatch"

    # 2) multi-tile grid (batch padding exercised) + bf16 MXU path
    x_big = jax.random.normal(k_x2, (40, state_dim + 4), dtype=jnp.float32)
    out_bf16 = jax.block_until_ready(
        dqn_forward(x_big, params, compute_dtype=jnp.bfloat16, block_b=16))
    ref_big = dqn_reference(x_big, params)
    assert out_bf16.shape == (40, 1)
    assert jnp.allclose(out_bf16, ref_big, atol=5e-2, rtol=5e-2), "bf16 mismatch"

    print("KERNEL_OK")
</pallas_src>

<mosaic_0001>
module attributes {stable_mosaic.version = 11 : i64} {
  func.func @dqn_mlp_kernel(%arg0: i32, %arg1: memref<8x36xf32, #tpu.memory_space<vmem>>, %arg2: memref<36x128xf32, #tpu.memory_space<vmem>>, %arg3: memref<1x128xf32, #tpu.memory_space<vmem>>, %arg4: memref<128x128xf32, #tpu.memory_space<vmem>>, %arg5: memref<1x128xf32, #tpu.memory_space<vmem>>, %arg6: memref<1x128xf32, #tpu.memory_space<vmem>>, %arg7: memref<1x1xf32, #tpu.memory_space<vmem>>, %arg8: memref<8x1xf32, #tpu.memory_space<vmem>>) attributes {dimension_semantics = [#tpu.dimension_semantics<parallel>], iteration_bounds = array<i64: 1>, scalar_prefetch = 0 : i64, scratch_operands = 0 : i64, tpu.core_type = #tpu.core_type<tc>, window_params = [{transform_indices = @transform_0, window_bounds = array<i64: 8, 36>}, {pipeline_mode = #tpu.pipeline_mode<synchronous>, transform_indices = @transform_1, window_bounds = array<i64: 36, 128>}, {pipeline_mode = #tpu.pipeline_mode<synchronous>, transform_indices = @transform_2, window_bounds = array<i64: 1, 128>}, {pipeline_mode = #tpu.pipeline_mode<synchronous>, transform_indices = @transform_3, window_bounds = array<i64: 128, 128>}, {pipeline_mode = #tpu.pipeline_mode<synchronous>, transform_indices = @transform_4, window_bounds = array<i64: 1, 128>}, {pipeline_mode = #tpu.pipeline_mode<synchronous>, transform_indices = @transform_5, window_bounds = array<i64: 1, 128>}, {pipeline_mode = #tpu.pipeline_mode<synchronous>, transform_indices = @transform_6, window_bounds = array<i64: 1, 1>}, {transform_indices = @transform_7, window_bounds = array<i64: 8, 1>}]} {
    %c0 = arith.constant 0 : index
    %c0_0 = arith.constant 0 : index
    %0 = vector.load %arg1[%c0, %c0_0] : memref<8x36xf32, #tpu.memory_space<vmem>>, vector<8x36xf32>
    %c0_1 = arith.constant 0 : index
    %c0_2 = arith.constant 0 : index
    %1 = vector.load %arg2[%c0_1, %c0_2] : memref<36x128xf32, #tpu.memory_space<vmem>>, vector<36x128xf32>
    %cst = arith.constant dense<0.000000e+00> : vector<8x128xf32>
    %2 = tpu.matmul %0, %1, %cst {dimension_numbers = #tpu.dot_dimension_numbers<[1], [0], [0], [1], [0, 0, 1, 1], [], []>} : vector<8x36xf32>, vector<36x128xf32>, vector<8x128xf32> -> vector<8x128xf32>
    %c0_3 = arith.constant 0 : index
    %c0_4 = arith.constant 0 : index
    %3 = vector.load %arg3[%c0_3, %c0_4] : memref<1x128xf32, #tpu.memory_space<vmem>>, vector<1x128xf32>
    %4 = vector.broadcast %3 : vector<1x128xf32> to vector<8x128xf32>
    %5 = arith.addf %2, %4 : vector<8x128xf32>
    %cst_5 = arith.constant 0.000000e+00 : f32
    %6 = vector.broadcast %cst_5 : f32 to vector<8x128xf32>
    %7 = arith.maximumf %5, %6 : vector<8x128xf32>
    %c0_6 = arith.constant 0 : index
    %c0_7 = arith.constant 0 : index
    %8 = vector.load %arg4[%c0_6, %c0_7] : memref<128x128xf32, #tpu.memory_space<vmem>>, vector<128x128xf32>
    %cst_8 = arith.constant dense<0.000000e+00> : vector<8x128xf32>
    %9 = tpu.matmul %7, %8, %cst_8 {dimension_numbers = #tpu.dot_dimension_numbers<[1], [0], [0], [1], [0, 0, 1, 1], [], []>} : vector<8x128xf32>, vector<128x128xf32>, vector<8x128xf32> -> vector<8x128xf32>
    %c0_9 = arith.constant 0 : index
    %c0_10 = arith.constant 0 : index
    %10 = vector.load %arg5[%c0_9, %c0_10] : memref<1x128xf32, #tpu.memory_space<vmem>>, vector<1x128xf32>
    %11 = vector.broadcast %10 : vector<1x128xf32> to vector<8x128xf32>
    %12 = arith.addf %9, %11 : vector<8x128xf32>
    %cst_11 = arith.constant 0.000000e+00 : f32
    %13 = vector.broadcast %cst_11 : f32 to vector<8x128xf32>
    %14 = arith.maximumf %12, %13 : vector<8x128xf32>
    %c0_12 = arith.constant 0 : index
    %c0_13 = arith.constant 0 : index
    %15 = vector.load %arg6[%c0_12, %c0_13] : memref<1x128xf32, #tpu.memory_space<vmem>>, vector<1x128xf32>
    %16 = vector.broadcast %15 : vector<1x128xf32> to vector<8x128xf32>
    %17 = arith.mulf %14, %16 : vector<8x128xf32>
    %cst_14 = arith.constant dense<0.000000e+00> : vector<8xf32>
    %18 = vector.multi_reduction <add>, %17, %cst_14 [1] : vector<8x128xf32> to vector<8xf32>
    %19 = vector.shape_cast %18 : vector<8xf32> to vector<8x1xf32>
    %c0_15 = arith.constant 0 : index
    %c0_16 = arith.constant 0 : index
    %20 = vector.load %arg7[%c0_15, %c0_16] : memref<1x1xf32, #tpu.memory_space<vmem>>, vector<1x1xf32>
    %21 = vector.broadcast %20 : vector<1x1xf32> to vector<8x1xf32>
    %22 = arith.addf %19, %21 : vector<8x1xf32>
    %c0_17 = arith.constant 0 : index
    %c0_18 = arith.constant 0 : index
    %23 = vector.load %arg8[%c0_17, %c0_18] : memref<8x1xf32, #tpu.memory_space<vmem>>, vector<8x1xf32>
    tpu.vector_store %arg8[%c0_17, %c0_18], %22 {strides = array<i32>} : memref<8x1xf32, #tpu.memory_space<vmem>>, vector<8x1xf32>,
    return
  }
  func.func @transform_0(%arg0: i32) -> (i32, i32) {
    %c0_i32 = arith.constant 0 : i32
    %c0_i32_0 = arith.constant 0 : i32
    return %arg0, %c0_i32 : i32, i32
  }
  func.func @transform_1(%arg0: i32) -> (i32, i32) {
    %c0_i32 = arith.constant 0 : i32
    %c0_i32_0 = arith.constant 0 : i32
    %c0_i32_1 = arith.constant 0 : i32
    return %c0_i32, %c0_i32_0 : i32, i32
  }
  func.func @transform_2(%arg0: i32) -> (i32, i32) {
    %c0_i32 = arith.constant 0 : i32
    %c0_i32_0 = arith.constant 0 : i32
    %c0_i32_1 = arith.constant 0 : i32
    return %c0_i32, %c0_i32_0 : i32, i32
  }
  func.func @transform_3(%arg0: i32) -> (i32, i32) {
    %c0_i32 = arith.constant 0 : i32
    %c0_i32_0 = arith.constant 0 : i32
    %c0_i32_1 = arith.constant 0 : i32
    return %c0_i32, %c0_i32_0 : i32, i32
  }
  func.func @transform_4(%arg0: i32) -> (i32, i32) {
    %c0_i32 = arith.constant 0 : i32
    %c0_i32_0 = arith.constant 0 : i32
    %c0_i32_1 = arith.constant 0 : i32
    return %c0_i32, %c0_i32_0 : i32, i32
  }
  func.func @transform_5(%arg0: i32) -> (i32, i32) {
    %c0_i32 = arith.constant 0 : i32
    %c0_i32_0 = arith.constant 0 : i32
    %c0_i32_1 = arith.constant 0 : i32
    return %c0_i32, %c0_i32_0 : i32, i32
  }
  func.func @transform_6(%arg0: i32) -> (i32, i32) {
    %c0_i32 = arith.constant 0 : i32
    %c0_i32_0 = arith.constant 0 : i32
    %c0_i32_1 = arith.constant 0 : i32
    return %c0_i32, %c0_i32_0 : i32, i32
  }
  func.func @transform_7(%arg0: i32) -> (i32, i32) {
    %c0_i32 = arith.constant 0 : i32
    %c0_i32_0 = arith.constant 0 : i32
    return %arg0, %c0_i32 : i32, i32
  }
}

</mosaic_0001>

<bundles_post_ra>
// kernel: tpu_custom_call.1
= control target key start
LH: loop header
LB: loop body
LE: loop exit
PB: predicated region body
PF: predicated region fallthrough
CT: control target
= control target key end

     0   :  { %s521_s0 = inlined_call_operand.hbm [shape: f32[8,36], index: 0, kind: input, shape index: {}]   ;;  %s522_s1 = inlined_call_operand.hbm [shape: f32[36,128], index: 1, kind: input, shape index: {}]   ;;  %s523_s2 = inlined_call_operand.vmem [shape: f32[1,128], index: 2, kind: input, shape index: {}]   ;;  %s524_s3 = inlined_call_operand.hbm [shape: f32[128,128], index: 3, kind: input, shape index: {}]   ;;  %s525_s4 = inlined_call_operand.vmem [shape: f32[1,128], index: 4, kind: input, shape index: {}]   ;;  %s526_s5 = inlined_call_operand.vmem [shape: f32[1,128], index: 5, kind: input, shape index: {}]   ;;  %s527_s6 = inlined_call_operand.<no memory space> [shape: f32[1,1], index: 6, kind: input, shape index: {}]   ;;  %s528_s7 = inlined_call_operand.vmem [shape: f32[8,1], index: 7, kind: output, shape index: {}]  }
   0x1   :  { %v12_v0 = vstv %s527_s6 }
   0x2   :  { %13 = vst [vmem:[#allocation2] sm:$0x1] %v12_v0 }
   0x3   :  { %14 = vsyncpa [#allocation4], 0 }
   0x4   :  { %15 = vsyncpa [#allocation6], 0  ;;  %s427_s26 = smov [#allocation5]  }
   0x5   :  { %s31_s27 = sshll.u32 %s427_s26, 4  ;;  %s32_s27 = int_to_ptr.vmem [resolvable:$true] %s31_s27 }
   0x6   :  { %s371_s28 = scalar_lea.vmem %s32_s27, 640  ;;  %p376_p1 = scmp.lt.s32.totalorder %s32_s27, %s32_s27 }
   0x7   :  { %p372_p0 = scmp.ne.s32.totalorder %s32_s27, %s371_s28  ;;  %p377_p2 = scmp.lt.s32.totalorder %s371_s28, %s371_s28 }
   0x9   :  { %p378_p3 = por %p377_p2, %p376_p1 }
   0xb   :  { %p379_p4 = pnand %p378_p3, %p372_p0 }
   0xd   :  { %382 = shalt.err (!%p379_p4)
}
   0xe   :  { %s428_s29 = smov 128   ;;  %s429_s30 = smov 8  }
   0xf   :  { %37 = dma.hbm_to_vmem [thread:$0]  %s522_s1, 640, %s32_s27, [#allocation6], %s428_s29, %s428_s29, %s429_s30  }
  0x10   :  { %s430_s6 = smov [#allocation3]   ;;  %s431_s11 = smov [#allocation7]  }
  0x11   :  { %s22_s10 = sshll.u32 %s430_s6, 4  ;;  %s45_s12 = sshll.u32 %s431_s11, 4  ;;  %s23_s10 = int_to_ptr.vmem [resolvable:$true] %s22_s10  ;;  %s46_s12 = int_to_ptr.vmem [resolvable:$true] %s45_s12 }
  0x12   :  { %s391_s13 = scalar_lea.vmem %s23_s10, 128  ;;  %p396_p6 = scmp.lt.s32.totalorder %s23_s10, %s23_s10 }
  0x13   :  { %p392_p5 = scmp.ne.s32.totalorder %s23_s10, %s391_s13  ;;  %p397_p7 = scmp.lt.s32.totalorder %s391_s13, %s391_s13 }
  0x15   :  { %p398_p8 = por %p397_p7, %p396_p6 }
  0x17   :  { %p399_p9 = pnand %p398_p8, %p392_p5 }
  0x19   :  { %402 = shalt.err (!%p399_p9)
}
  0x1a   :  { %25 = dma.hbm_to_vmem [thread:$0]  %s521_s0, 128, %s23_s10, [#allocation4]  }
  0x1b   :  { %s411_s16 = scalar_lea.vmem %s46_s12, 2048  ;;  %p416_p11 = scmp.lt.s32.totalorder %s46_s12, %s46_s12 }
  0x1c   :  { %p412_p10 = scmp.ne.s32.totalorder %s46_s12, %s411_s16  ;;  %p417_p12 = scmp.lt.s32.totalorder %s411_s16, %s411_s16 }
  0x1e   :  { %p418_p13 = por %p417_p12, %p416_p11 }
  0x20   :  { %p419_p0 = pnand %p418_p13, %p412_p10 }
  0x22   :  { %422 = shalt.err (!%p419_p0)
}
  0x23   :  { %51 = dma.hbm_to_vmem [thread:$0]  %s524_s3, 2048, %s46_s12, [#allocation6], %s428_s29, %s428_s29, %s429_s30  }
  0x24   :  { %423 = dma.done.wait [#allocation4], 128  }
  0x25   :  { %424 = vsyncadd [#allocation4], 4294967168 }
  0x26   :  { %425 = dma.done.wait [#allocation6], 2688  }
  0x27   :  { %426 = vsyncadd [#allocation6], 4294964608  ;;  %v432_v1 = vmov 0.0   ;;  %vm433_vm0 = vmmov 0   ;;  %vm84_vm1 = vcmask 1043456   ;;  %v71_v3 = vld [vmem:[#allocation5 + $0x18] sm:$0xff] }
  0x28   :  { %308 = vmatprep.subr.mxu0 %v432_v1  ;;  %318 = vmatprep.mubr.msk.f32.mxu0 %vm433_vm0, %v432_v1  ;;  %v72_v2 = vld [vmem:[#allocation5 + $0x20] sm:$0xf]  ;;  %v70_v4 = vld [vmem:[#allocation5 + $0x10] sm:$0xff]  ;;  %v173_v6 = vld [vmem:[#allocation7 + $0x70] sm:$0xff]  ;;  %vm80_vm2 = vcmask 293888   ;;  %vm271_vm3 = vcmask 7168  }
  0x29   :  { %321 = vmatprep.subr.mxu1 %v432_v1  ;;  %353 = vmatprep.mubr.msk.f32.mxu1 %vm433_vm0, %v432_v1  ;;  %v174_v5 = vld [vmem:[#allocation7 + $0x78] sm:$0xff]  ;;  %v69_v7 = vld [vmem:[#allocation5 + $0x8] sm:$0xff]  ;;  %v172_v8 = vld [vmem:[#allocation7 + $0x68] sm:$0xff] }
  0x2a   :  { %309 = vmatpush3.msk.msra.mxu0 %vm84_vm1, %v72_v2  ;;  %322 = vmatpush3.msra.mxu1 %v174_v5  ;;  %v68_v9 = vld [vmem:[#allocation5] sm:$0xff]  ;;  %v171_v10 = vld [vmem:[#allocation7 + $0x60] sm:$0xff]  ;;  %v67_v11 = vld [vmem:[#allocation3] sm:$0xff] }
  0x2b   :  { %310 = vmatprep.subr.mxu0 %v432_v1  ;;  %323 = vmatprep.subr.mxu1 %v432_v1  ;;  %v170_v12 = vld [vmem:[#allocation7 + $0x58] sm:$0xff]  ;;  %v169_v13 = vld [vmem:[#allocation7 + $0x50] sm:$0xff]  ;;  %v168_v14 = vld [vmem:[#allocation7 + $0x48] sm:$0xff] }
  0x2c   :  { %311 = vmatpush3.msra.mxu0 %v71_v3  ;;  %324 = vmatpush3.msra.mxu1 %v173_v6  ;;  %v167_v15 = vld [vmem:[#allocation7 + $0x40] sm:$0xff]  ;;  %v166_v16 = vld [vmem:[#allocation7 + $0x38] sm:$0xff]  ;;  %v165_v17 = vld [vmem:[#allocation7 + $0x30] sm:$0xff] }
  0x2d   :  { %312 = vmatprep.subr.mxu0 %v432_v1  ;;  %325 = vmatprep.subr.mxu1 %v432_v1  ;;  %v164_v18 = vld [vmem:[#allocation7 + $0x28] sm:$0xff]  ;;  %v163_v19 = vld [vmem:[#allocation7 + $0x20] sm:$0xff]  ;;  %v162_v20 = vld [vmem:[#allocation7 + $0x18] sm:$0xff] }
  0x2e   :  { %313 = vmatpush3.msra.mxu0 %v70_v4  ;;  %326 = vmatpush3.msra.mxu1 %v172_v8  ;;  %v161_v21 = vld [vmem:[#allocation7 + $0x10] sm:$0xff]  ;;  %v160_v22 = vld [vmem:[#allocation7 + $0x8] sm:$0xff]  ;;  %v159_v23 = vld [vmem:[#allocation7] sm:$0xff] }
  0x2f   :  { %314 = vmatprep.subr.mxu0 %v432_v1  ;;  %327 = vmatprep.subr.mxu1 %v432_v1  ;;  %v279_v24 = vld [vmem:[%s523_s2] ss:$0 sm:$0xff] }
  0x30   :  { %315 = vmatpush3.msra.mxu0 %v69_v7  ;;  %328 = vmatpush3.msra.mxu1 %v171_v10  ;;  %v282_v29 = vld [vmem:[%s525_s4] ss:$0 sm:$0xff] }
  0x31   :  { %316 = vmatprep.subr.mxu0 %v432_v1  ;;  %329 = vmatprep.subr.mxu1 %v432_v1  ;;  %v283_v33 = vld [vmem:[%s526_s5] ss:$0 sm:$0xff] }
  0x32   :  { %317 = vmatpush3.msra.mxu0 %v68_v9  ;;  %330 = vmatpush3.msra.mxu1 %v170_v12  ;;  %v284_v36 = vld [vmem:[#allocation2] ss:$0 sm:$0xff] }
  0x33   :  { %319 = vmatmul.mubr.msk.f32.vlgmr.msra.gmra.mxu0 %vm80_vm2, %v67_v11  ;;  %331 = vmatprep.subr.mxu1 %v432_v1 }
  0x34   :  { %332 = vmatpush3.msra.mxu1 %v169_v13 }
  0x35   :  { %333 = vmatprep.subr.mxu1 %v432_v1 }
  0x36   :  { %334 = vmatpush3.msra.mxu1 %v168_v14 }
  0x37   :  { %335 = vmatprep.subr.mxu1 %v432_v1 }
  0x38   :  { %336 = vmatpush3.msra.mxu1 %v167_v15 }
  0x39   :  { %337 = vmatprep.subr.mxu1 %v432_v1 }
  0x3a   :  { %338 = vmatpush3.msra.mxu1 %v166_v16 }
  0x3b   :  { %339 = vmatprep.subr.mxu1 %v432_v1 }
  0x3c   :  { %340 = vmatpush3.msra.mxu1 %v165_v17 }
  0x3d   :  { %341 = vmatprep.subr.mxu1 %v432_v1 }
  0x3e   :  { %342 = vmatpush3.msra.mxu1 %v164_v18 }
  0x3f   :  { %343 = vmatprep.subr.mxu1 %v432_v1 }
  0x40   :  { %344 = vmatpush3.msra.mxu1 %v163_v19 }
  0x41   :  { %345 = vmatprep.subr.mxu1 %v432_v1 }
  0x42   :  { %346 = vmatpush3.msra.mxu1 %v162_v20 }
  0x43   :  { %347 = vmatprep.subr.mxu1 %v432_v1 }
  0x44   :  { %348 = vmatpush3.msra.mxu1 %v161_v21 }
  0x45   :  { %349 = vmatprep.subr.mxu1 %v432_v1 }
  0x46   :  { %350 = vmatpush3.msra.mxu1 %v160_v22 }
  0x47   :  { %351 = vmatprep.subr.mxu1 %v432_v1 }
  0x48   :  { %352 = vmatpush3.msra.mxu1 %v159_v23 }
  0xf3   :  { %v154_v25 = vpop.f32.mrf.mxu0 }
  0xf4   :  { %v155_v26 = vadd.f32 %v279_v24, %v154_v25 }
  0xf5   :  { %v320_v27 = vpop.f32.mrf.mxu0 }
  0xf6   :  { %v158_v28 = vmax.f32 %v155_v26, 0.0 }
  0xf8   :  { %354 = vmatmul.mubr.f32.vlgmr.msra.gmra.mxu1 %v158_v28 }
 0x1b8   :  { %v248_v30 = vpop.f32.mrf.mxu1 }
 0x1b9   :  { %v249_v31 = vadd.f32 %v282_v29, %v248_v30 }
 0x1ba   :  { %v355_v32 = vpop.f32.mrf.mxu1 }
 0x1bb   :  { %v252_v34 = vmax.f32 %v249_v31, 0.0 }
 0x1bd   :  { %v260_v35 = vmul.f32 %v283_v33, %v252_v34 }
 0x1bf   :  { %261 = vadd.xlane.f32.xlu0 %v260_v35 }
 0x248   :  { %v262_v37 = vpop.xlane.xlu0 %261 }
 0x249   :  { %v270_v38 = vadd.f32 %v284_v36, %v262_v37 }
 0x24b   :  { %272 = vst.msk [vmem:[%s528_s7] sm:$0xff] %vm271_vm3, %v270_v38 }
 0x24c   :  { %277 = vsyncpa [#allocation4], 1 }
 0x24d   :  { %278 = vsyncpa [#allocation6], 1 }

</bundles_post_ra>
